<compile_context>
chip_gen: v7x
topology: tpu7x:2x2x1
jax: 0.10.0
libtpu: 0.0.40
codegen_flags: <defaults>
</compile_context>

<pallas_src>
import jax
import jax.numpy as jnp
from jax.experimental import pallas as pl
from jax.experimental.pallas import tpu as pltpu

_LANE = 128


def _block_config():
    """Per-generation (max_block_rows, vmem_limit_bytes).

    Bytes per input block = rows * 128 * 4; two inputs x two pipeline buffers must fit
    the scoped-VMEM budget (v5e 16 MiB default, v6e/v7x 32 MiB default, raised on v7x).
    """
    try:
        kind = jax.devices()[0].device_kind.lower()
    except Exception:
        kind = ""
    if "v7" in kind or "7x" in kind:
        # 8 MiB per input block; 2 inputs x 2 buffers = 32 MiB -> raise the scoped
        # limit (64 MiB physical per TC on v7x) to keep headroom.
        return 16384, 40 << 20
    if "v6" in kind:
        # 4 MiB per input block; 16 MiB double-buffered fits the 32 MiB default.
        return 8192, None
    # v5e (16 MiB scoped default) and unknown chips: 2 MiB blocks, 8 MiB double-buffered.
    return 4096, None


def _single_block_kernel(n_valid):
    """Whole problem fits one grid step: no scratch, no accumulator, direct reduce."""

    def kernel(pred_ref, target_ref, out_ref):
        pred = pred_ref[...]
        tgt = target_ref[...].astype(jnp.float32)
        # round(sigmoid(x)) == 1  <=>  x > 0  (round-half-to-even sends sigmoid(0)=0.5
        # to 0, so strict '>' matches torch).
        predicted = jnp.where(pred > 0, jnp.float32(1.0), jnp.float32(0.0))
        # torch: round(sigmoid(NaN)) is NaN and never equals the target.
        not_nan = pred == pred
        correct = ((predicted == tgt) & not_nan).astype(jnp.int32)
        out_ref[0, 0] = jnp.sum(correct).astype(jnp.float32) / jnp.float32(n_valid)

    return kernel


def _multi_step_kernel(pred_ref, target_ref, out_ref, acc_ref):
    """Tiled path: per-core int32 accumulation into a single (8, 128) vreg tile."""
    i = pl.program_id(1)

    @pl.when(i == 0)
    def _():
        acc_ref[...] = jnp.zeros_like(acc_ref)

    pred = pred_ref[...]
    tgt = target_ref[...].astype(jnp.float32)
    predicted = jnp.where(pred > 0, jnp.float32(1.0), jnp.float32(0.0))
    not_nan = pred == pred
    correct = ((predicted == tgt) & not_nan).astype(jnp.int32)
    # (block_rows, 128) -> (block_rows//8, 8, 128): the reshape is sublane-tile aligned
    # (free) and the axis-0 sum is pure VPU adds; only one vreg of accumulator traffic.
    acc_ref[...] += correct.reshape(-1, 8, _LANE).sum(axis=0)

    @pl.when(i == pl.num_programs(1) - 1)
    def _():
        # Per-core partial count; the final 2-element sum + divide is done on the host.
        # int32 stays exact for any count reachable with on-chip HBM capacities.
        out_ref[0, 0] = jnp.sum(acc_ref[...])


def get_accuracy(pred, target, *, max_block_rows=None):
    """Matches torch: mean((round(sigmoid(pred)) == target).float()) -> scalar f32."""
    n = pred.size
    pred_f = jnp.ravel(pred)
    tgt_f = jnp.ravel(target)

    if max_block_rows is None:
        max_rows, vmem_limit = _block_config()
    else:
        max_rows, vmem_limit = int(max_block_rows), None
    assert max_rows % 8 == 0, "block rows must be a multiple of the sublane count (8)"

    rows = pl.cdiv(n, _LANE)

    if rows <= max_rows:
        # Single block / single grid step: pure fixed cost, no accumulator scratch.
        block_rows = max(8, pl.cdiv(rows, 8) * 8)
        num_cores = 1
        steps = 1
        total_rows = block_rows
    else:
        # Tiled path: split rows between two TensorCores via a leading "parallel" axis
        # (sequential on 1-TC chips, ~2x HBM bandwidth on v7x megacore).
        block_rows = max_rows
        num_cores = 2
        steps = pl.cdiv(rows, num_cores * block_rows)
        total_rows = num_cores * steps * block_rows

    n_pad = total_rows * _LANE - n
    if n_pad:
        # Padded predictions are 0.0 (pred=0 -> not > 0); padded targets are 2 so the
        # tail can never count as correct -> no in-kernel tail-mask arithmetic.
        pred_f = jnp.pad(pred_f, (0, n_pad))
        tgt_f = jnp.pad(tgt_f, (0, n_pad), constant_values=2)

    pred2d = pred_f.reshape(total_rows, _LANE)
    tgt2d = tgt_f.reshape(total_rows, _LANE)

    if num_cores == 1:
        out = pl.pallas_call(
            _single_block_kernel(n),
            out_shape=jax.ShapeDtypeStruct((1, 1), jnp.float32),
            grid=(1,),
            in_specs=[
                pl.BlockSpec((block_rows, _LANE), lambda i: (0, 0)),
                pl.BlockSpec((block_rows, _LANE), lambda i: (0, 0)),
            ],
            out_specs=pl.BlockSpec((1, 1), lambda i: (0, 0), memory_space=pltpu.SMEM),
            compiler_params=pltpu.CompilerParams(dimension_semantics=("arbitrary",)),
        )(pred2d, tgt2d)
        return out[0, 0]

    counts = pl.pallas_call(
        _multi_step_kernel,
        out_shape=jax.ShapeDtypeStruct((num_cores, 1), jnp.int32),
        grid=(num_cores, steps),
        in_specs=[
            pl.BlockSpec((block_rows, _LANE), lambda c, i: (c * steps + i, 0)),
            pl.BlockSpec((block_rows, _LANE), lambda c, i: (c * steps + i, 0)),
        ],
        out_specs=pl.BlockSpec((1, 1), lambda c, i: (c, 0), memory_space=pltpu.SMEM),
        scratch_shapes=[pltpu.VMEM((8, _LANE), jnp.int32)],
        compiler_params=pltpu.CompilerParams(
            dimension_semantics=("parallel", "arbitrary"),
            vmem_limit_bytes=vmem_limit,
        ),
    )(pred2d, tgt2d)
    # Exact int32 count; the f32 mean matches the torch/f32 reference precision.
    return jnp.sum(counts).astype(jnp.float32) / jnp.float32(n)


def _reference(pred, target):
    predicted = jnp.round(jax.nn.sigmoid(pred.astype(jnp.float32)))
    correct = (predicted == target.astype(jnp.float32)).astype(jnp.float32)
    return jnp.mean(correct)


if __name__ == "__main__":
    key = jax.random.PRNGKey(0)
    k1, k2, k3, k4 = jax.random.split(key, 4)

    # Small shapes consistent with the module: batch=2, 4096 point logits, binary targets.
    pred = jax.random.normal(k1, (2, 4096), dtype=jnp.float32)
    target = jax.random.bernoulli(k2, 0.5, (2, 4096)).astype(jnp.float32)

    ref = _reference(pred, target)
    acc = jax.block_until_ready(get_accuracy(pred, target))
    assert acc.shape == (), f"expected scalar, got {acc.shape}"
    assert jnp.allclose(acc, ref, atol=1e-6), (acc, ref)

    # Exercise the tiled / dual-core code path on the same small input (forced tiny blocks).
    acc_tiled = jax.block_until_ready(get_accuracy(pred, target, max_block_rows=8))
    assert jnp.allclose(acc_tiled, ref, atol=1e-6), (acc_tiled, ref)

    # Ragged size (not a multiple of 128): checks the pad-with-target=2 tail handling.
    pred_r = jax.random.normal(k3, (3, 1000), dtype=jnp.float32)
    target_r = jax.random.bernoulli(k4, 0.5, (3, 1000)).astype(jnp.float32)
    ref_r = _reference(pred_r, target_r)
    acc_r = jax.block_until_ready(get_accuracy(pred_r, target_r))
    assert jnp.allclose(acc_r, ref_r, atol=1e-6), (acc_r, ref_r)
    acc_rt = jax.block_until_ready(get_accuracy(pred_r, target_r, max_block_rows=8))
    assert jnp.allclose(acc_rt, ref_r, atol=1e-6), (acc_rt, ref_r)

    print("KERNEL_OK")
</pallas_src>

<mosaic_0001>
module attributes {stable_mosaic.version = 11 : i64} {
  func.func @kernel(%arg0: i32, %arg1: memref<64x128xf32, #tpu.memory_space<vmem>>, %arg2: memref<64x128xf32, #tpu.memory_space<vmem>>, %arg3: memref<1x1xf32, #tpu.memory_space<smem>>) attributes {dimension_semantics = [#tpu.dimension_semantics<arbitrary>], iteration_bounds = array<i64: 1>, scalar_prefetch = 0 : i64, scratch_operands = 0 : i64, tpu.core_type = #tpu.core_type<tc>, window_params = [{pipeline_mode = #tpu.pipeline_mode<synchronous>, transform_indices = @transform_0, window_bounds = array<i64: 64, 128>}, {pipeline_mode = #tpu.pipeline_mode<synchronous>, transform_indices = @transform_1, window_bounds = array<i64: 64, 128>}, {transform_indices = @transform_2, window_bounds = array<i64: 1, 1>}]} {
    %c0 = arith.constant 0 : index
    %c0_0 = arith.constant 0 : index
    %0 = vector.load %arg1[%c0, %c0_0] : memref<64x128xf32, #tpu.memory_space<vmem>>, vector<64x128xf32>
    %c0_1 = arith.constant 0 : index
    %c0_2 = arith.constant 0 : index
    %1 = vector.load %arg2[%c0_1, %c0_2] : memref<64x128xf32, #tpu.memory_space<vmem>>, vector<64x128xf32>
    %cst = arith.constant 0.000000e+00 : f32
    %2 = vector.broadcast %cst : f32 to vector<64x128xf32>
    %3 = arith.cmpf ogt, %0, %2 : vector<64x128xf32>
    %cst_3 = arith.constant 1.000000e+00 : f32
    %cst_4 = arith.constant 0.000000e+00 : f32
    %4 = vector.broadcast %cst_3 : f32 to vector<64x128xf32>
    %5 = vector.broadcast %cst_4 : f32 to vector<64x128xf32>
    %6 = arith.select %3, %4, %5 : vector<64x128xi1>, vector<64x128xf32>
    %7 = arith.cmpf oeq, %0, %0 : vector<64x128xf32>
    %8 = arith.cmpf oeq, %6, %1 : vector<64x128xf32>
    %9 = arith.andi %8, %7 : vector<64x128xi1>
    %10 = arith.extui %9 : vector<64x128xi1> to vector<64x128xi32>
    %11 = vector.shape_cast %10 : vector<64x128xi32> to vector<1x64x128xi32>
    %cst_5 = arith.constant dense<0> : vector<1xi32>
    %12 = vector.multi_reduction <add>, %11, %cst_5 [1, 2] : vector<1x64x128xi32> to vector<1xi32>
    %13 = vector.shape_cast %12 : vector<1xi32> to vector<1x1x1xi32>
    %14 = vector.extract %13[0, 0, 0] : i32 from vector<1x1x1xi32>
    %15 = arith.sitofp %14 : i32 to f32
    %cst_6 = arith.constant 8.192000e+03 : f32
    %16 = arith.divf %15, %cst_6 : f32
    %c0_7 = arith.constant 0 : index
    %c0_8 = arith.constant 0 : index
    %17 = memref.load %arg3[%c0_7, %c0_8] : memref<1x1xf32, #tpu.memory_space<smem>>
    memref.store %16, %arg3[%c0_7, %c0_8] : memref<1x1xf32, #tpu.memory_space<smem>>
    return
  }
  func.func @transform_0(%arg0: i32) -> (i32, i32) {
    %c0_i32 = arith.constant 0 : i32
    %c0_i32_0 = arith.constant 0 : i32
    %c0_i32_1 = arith.constant 0 : i32
    return %c0_i32, %c0_i32_0 : i32, i32
  }
  func.func @transform_1(%arg0: i32) -> (i32, i32) {
    %c0_i32 = arith.constant 0 : i32
    %c0_i32_0 = arith.constant 0 : i32
    %c0_i32_1 = arith.constant 0 : i32
    return %c0_i32, %c0_i32_0 : i32, i32
  }
  func.func @transform_2(%arg0: i32) -> (i32, i32) {
    %c0_i32 = arith.constant 0 : i32
    %c0_i32_0 = arith.constant 0 : i32
    %c0_i32_1 = arith.constant 0 : i32
    return %c0_i32, %c0_i32_0 : i32, i32
  }
}

</mosaic_0001>

<bundles_post_ra>
// kernel: tpu_custom_call.1
= control target key start
LH: loop header
LB: loop body
LE: loop exit
PB: predicated region body
PF: predicated region fallthrough
CT: control target
= control target key end

     0   :  { %7 = vsyncpa [#allocation3], 0  ;;  %s281_s0 = inlined_call_operand.hbm [shape: f32[64,128], index: 0, kind: input, shape index: {}]   ;;  %s282_s1 = inlined_call_operand.hbm [shape: f32[64,128], index: 1, kind: input, shape index: {}]   ;;  %s283_s2 = inlined_call_operand.hbm [shape: f32[1,1], index: 2, kind: output, shape index: {}]  }
   0x1   :  { %8 = vsyncpa [#allocation6], 0 }
   0x2   :  { %9 = vsyncpa [#allocation4], 0  ;;  %s220_s9 = smov [#allocation2]   ;;  %s160_s13 = scalar_lea.hbm %s281_s0, 1024 }
   0x3   :  { %s15_s10 = sshll.u32 %s220_s9, 4  ;;  %p161_p0 = scmp.ne.s32.totalorder %s281_s0, %s160_s13  ;;  %s16_s10 = int_to_ptr.vmem [resolvable:$true] %s15_s10 }
   0x4   :  { %p164_p1 = scmp.lt.u32.totalorder %s160_s13, %s281_s0 }
   0x6   :  { %p166_p2 = pnand %p164_p1, %p161_p0 }
   0x8   :  { %169 = shalt.err (!%p166_p2)
}
   0x9   :  { %s170_s18 = scalar_lea.vmem %s16_s10, 1024  ;;  %p175_p4 = scmp.lt.s32.totalorder %s16_s10, %s16_s10 }
   0xa   :  { %p171_p3 = scmp.ne.s32.totalorder %s16_s10, %s170_s18  ;;  %p176_p5 = scmp.lt.s32.totalorder %s170_s18, %s170_s18 }
   0xc   :  { %p177_p6 = por %p176_p5, %p175_p4 }
   0xe   :  { %p178_p7 = pnand %p177_p6, %p171_p3 }
  0x10   :  { %181 = shalt.err (!%p178_p7)
}
  0x11   :  { %s221_s19 = smov 128   ;;  %s222_s20 = smov 8  }
  0x12   :  { %21 = dma.hbm_to_vmem [thread:$0]  %s281_s0, 1024, %s16_s10, [#allocation3], %s221_s19, %s221_s19, %s222_s20  }
  0x13   :  { %s223_s23 = smov [#allocation5]   ;;  %s182_s27 = scalar_lea.hbm %s282_s1, 1024 }
  0x14   :  { %s27_s24 = sshll.u32 %s223_s23, 4  ;;  %p183_p8 = scmp.ne.s32.totalorder %s282_s1, %s182_s27  ;;  %s28_s24 = int_to_ptr.vmem [resolvable:$true] %s27_s24 }
  0x15   :  { %p186_p9 = scmp.lt.u32.totalorder %s182_s27, %s282_s1 }
  0x17   :  { %p188_p10 = pnand %p186_p9, %p183_p8 }
  0x19   :  { %191 = shalt.err (!%p188_p10)
}
  0x1a   :  { %s192_s4 = scalar_lea.vmem %s28_s24, 1024  ;;  %p197_p12 = scmp.lt.s32.totalorder %s28_s24, %s28_s24 }
  0x1b   :  { %p193_p11 = scmp.ne.s32.totalorder %s28_s24, %s192_s4  ;;  %p198_p13 = scmp.lt.s32.totalorder %s192_s4, %s192_s4 }
  0x1d   :  { %p199_p0 = por %p198_p13, %p197_p12 }
  0x1f   :  { %p200_p1 = pnand %p199_p0, %p193_p11 }
  0x21   :  { %203 = shalt.err (!%p200_p1)
}
  0x22   :  { %33 = dma.hbm_to_vmem [thread:$0]  %s282_s1, 1024, %s28_s24, [#allocation6], %s221_s19, %s221_s19, %s222_s20  }
  0x23   :  { %214 = dma.done.wait [#allocation3], 1024  }
  0x24   :  { %215 = vsyncadd [#allocation3], 4294966272 }
  0x25   :  { %216 = dma.done.wait [#allocation6], 1024  }
  0x26   :  { %217 = vsyncadd [#allocation6], 4294966272  ;;  %v40_v0 = vld [vmem:[#allocation2] sm:$0xff]  ;;  %v41_v1 = vld [vmem:[#allocation2 + $0x8] sm:$0xff]  ;;  %v224_v11 = vmov 0.0   ;;  %v225_v25 = vmov 0  }
  0x27   :  { %v42_v2 = vld [vmem:[#allocation2 + $0x10] sm:$0xff]  ;;  %v43_v3 = vld [vmem:[#allocation2 + $0x18] sm:$0xff]  ;;  %v44_v4 = vld [vmem:[#allocation2 + $0x20] sm:$0xff]  ;;  %vm56_vm0 = vcmp.gt.f32.partialorder %v40_v0, 0.0  ;;  %vm57_vm1 = vcmp.gt.f32.partialorder %v41_v1, 0.0  ;;  %vm72_vm7 = vcmp.eq.f32.partialorder %v40_v0, %v40_v0  ;;  %vm73_vm9 = vcmp.eq.f32.partialorder %v41_v1, %v41_v1  ;;  %s204_s10 = scalar_lea.hbm %s283_s2, 16 }
  0x28   :  { %v45_v5 = vld [vmem:[#allocation2 + $0x28] sm:$0xff]  ;;  %vm58_vm2 = vcmp.gt.f32.partialorder %v42_v2, 0.0  ;;  %v46_v6 = vld [vmem:[#allocation2 + $0x30] sm:$0xff]  ;;  %vm59_vm3 = vcmp.gt.f32.partialorder %v43_v3, 0.0  ;;  %v47_v7 = vld [vmem:[#allocation2 + $0x38] sm:$0xff]  ;;  %vm60_vm4 = vcmp.gt.f32.partialorder %v44_v4, 0.0  ;;  %vm75_vm14 = vcmp.eq.f32.partialorder %v43_v3, %v43_v3  ;;  %p205_p2 = scmp.ne.s32.totalorder %s283_s2, %s204_s10  ;;  %p208_p3 = scmp.lt.u32.totalorder %s204_s10, %s283_s2 }
  0x29   :  { %v48_v8 = vld [vmem:[#allocation5] sm:$0xff]  ;;  %v49_v9 = vld [vmem:[#allocation5 + $0x8] sm:$0xff]  ;;  %v50_v10 = vld [vmem:[#allocation5 + $0x10] sm:$0xff]  ;;  %vm61_vm5 = vcmp.gt.f32.partialorder %v45_v5, 0.0  ;;  %v64_v12 = vsel %vm56_vm0, 1.0, %v224_v11  ;;  %v65_v13 = vsel %vm57_vm1, 1.0, %v224_v11  ;;  %vm76_vm1 = vcmp.eq.f32.partialorder %v44_v4, %v44_v4 }
  0x2a   :  { %v66_v14 = vsel %vm58_vm2, 1.0, %v224_v11  ;;  %v51_v15 = vld [vmem:[#allocation5 + $0x18] sm:$0xff]  ;;  %vm62_vm6 = vcmp.gt.f32.partialorder %v46_v6, 0.0  ;;  %v67_v16 = vsel %vm59_vm3, 1.0, %v224_v11  ;;  %v52_v17 = vld [vmem:[#allocation5 + $0x20] sm:$0xff]  ;;  %vm63_vm8 = vcmp.gt.f32.partialorder %v47_v7, 0.0  ;;  %p210_p4 = pnand %p208_p3, %p205_p2 }
  0x2b   :  { %v68_v18 = vsel %vm60_vm4, 1.0, %v224_v11  ;;  %v53_v19 = vld [vmem:[#allocation5 + $0x28] sm:$0xff]  ;;  %v69_v20 = vsel %vm61_vm5, 1.0, %v224_v11  ;;  %vm80_vm11 = vcmp.eq.f32.partialorder %v64_v12, %v48_v8  ;;  %vm81_vm12 = vcmp.eq.f32.partialorder %v65_v13, %v49_v9  ;;  %v54_v21 = vld [vmem:[#allocation5 + $0x30] sm:$0xff]  ;;  %v55_v23 = vld [vmem:[#allocation5 + $0x38] sm:$0xff] }
  0x2c   :  { %vm82_vm13 = vcmp.eq.f32.partialorder %v66_v14, %v50_v10  ;;  %v70_v22 = vsel %vm62_vm6, 1.0, %v224_v11  ;;  %vm83_vm15 = vcmp.eq.f32.partialorder %v67_v16, %v51_v15  ;;  %vm88_vm0 = vmand %vm80_vm11, %vm72_vm7  ;;  %v71_v24 = vsel %vm63_vm8, 1.0, %v224_v11 }
  0x2d   :  { %vm84_vm2 = vcmp.eq.f32.partialorder %v68_v18, %v52_v17  ;;  %vm89_vm3 = vmand %vm81_vm12, %vm73_vm9  ;;  %vm77_vm4 = vcmp.eq.f32.partialorder %v45_v5, %v45_v5  ;;  %vm85_vm10 = vcmp.eq.f32.partialorder %v69_v20, %v53_v19  ;;  %vm284_vm5 = vcmp.eq.f32.partialorder %v42_v2, %v42_v2 }
  0x2e   :  { %vm90_vm6 = vmand %vm82_vm13, %vm284_vm5  ;;  %vm78_vm7 = vcmp.eq.f32.partialorder %v46_v6, %v46_v6  ;;  %vm86_vm11 = vcmp.eq.f32.partialorder %v70_v22, %v54_v21  ;;  %v96_v26 = vsel %vm88_vm0, 1, %v225_v25  ;;  %vm79_vm9 = vcmp.eq.f32.partialorder %v47_v7, %v47_v7 }
  0x2f   :  { %vm91_vm8 = vmand %vm83_vm15, %vm75_vm14  ;;  %vm87_vm12 = vcmp.eq.f32.partialorder %v71_v24, %v55_v23  ;;  %v97_v27 = vsel %vm89_vm3, 1, %v225_v25  ;;  %v98_v28 = vsel %vm90_vm6, 1, %v225_v25 }
  0x30   :  { %vm92_vm5 = vmand %vm84_vm2, %vm76_vm1  ;;  %v99_v30 = vsel %vm91_vm8, 1, %v225_v25 }
  0x31   :  { %vm93_vm13 = vmand %vm85_vm10, %vm77_vm4  ;;  %v100_v29 = vsel %vm92_vm5, 1, %v225_v25 }
  0x32   :  { %vm94_vm14 = vmand %vm86_vm11, %vm78_vm7  ;;  %v101_v31 = vsel %vm93_vm13, 1, %v225_v25  ;;  %v104_v32 = vadd.s32 %v100_v29, %v96_v26 }
  0x33   :  { %vm95_vm15 = vmand %vm87_vm12, %vm79_vm9  ;;  %v102_v33 = vsel %vm94_vm14, 1, %v225_v25  ;;  %v105_v34 = vadd.s32 %v101_v31, %v97_v27 }
  0x34   :  { %v103_v35 = vsel %vm95_vm15, 1, %v225_v25  ;;  %v106_v36 = vadd.s32 %v102_v33, %v98_v28 }
  0x35   :  { %v107_v37 = vadd.s32 %v103_v35, %v99_v30  ;;  %v108_v38 = vadd.s32 %v105_v34, %v104_v32 }
  0x37   :  { %v109_v39 = vadd.s32 %v107_v37, %v106_v36 }
  0x39   :  { %v110_v40 = vadd.s32 %v109_v39, %v108_v38 }
  0x3b   :  { %v112_v41 = vshrl.u32 %v110_v40, 16  ;;  %v111_v42 = vand.u32 65535, %v110_v40 }
  0x3d   :  { %v114_v43 = vcvt.s32.f32 %v112_v41  ;;  %v113_v44 = vcvt.s32.f32 %v111_v42 }
  0x3f   :  { %117 = vadd.xlane.f32.xlu0 %v114_v43 }
  0x43   :  { %115 = vadd.xlane.f32.xlu0 %v113_v44 }
  0xcc   :  { %v118_v45 = vpop.xlane.xlu0 %117 }
  0xcd   :  { %v120_v46 = vcvt.f32.s32 %v118_v45 }
  0xcf   :  { %v121_v48 = vshll.u32 %v120_v46, 16 }
  0xd0   :  { %v116_v47 = vpop.xlane.xlu0 %115 }
  0xd1   :  { %v119_v49 = vcvt.f32.s32 %v116_v47 }
  0xd3   :  { %v122_v50 = vadd.s32 %v121_v48, %v119_v49 }
  0xd5   :  { %v123_v51 = vrot.slane %v122_v50, 4 }
  0xd7   :  { %v124_v52 = vadd.s32 %v123_v51, %v122_v50 }
  0xd9   :  { %v125_v53 = vrot.slane %v124_v52, 2 }
  0xdb   :  { %v126_v54 = vadd.s32 %v125_v53, %v124_v52 }
  0xdd   :  { %v127_v55 = vrot.slane %v126_v54, 1 }
  0xdf   :  { %v128_v56 = vadd.s32 %v127_v55, %v126_v54 }
  0xe1   :  { %151 = vpush %v128_v56 }
 0x112   :  { %s152_s1 = spop %151 }
 0x113   :  { %s130_s6 = scvt.s32.f32 %s152_s1 }
 0x115   :  { %s133_s7 = smul.f32 0.00012207031, %s130_s6 }
 0x117   :  { %135 = sst [smem:[#allocation7]] %s133_s7 }
 0x118   :  { %213 = shalt.err (!%p210_p4)
}
 0x119   :  { %s226_s15 = smov [#allocation7]  }
 0x11a   :  { %143 = dma.smem_to_hbm %s226_s15, 16, %s283_s2, [#allocation4]  }
 0x11b   :  { %218 = dma.done.wait [#allocation4], 16  }
 0x11c   :  { %219 = vsyncadd [#allocation4], 4294967280 }
 0x11d   :  { %147 = sfence }
 0x11e   :  { %148 = vsyncpa [#allocation3], 1 }
 0x11f   :  { %149 = vsyncpa [#allocation6], 1 }
 0x120   :  { %150 = vsyncpa [#allocation4], 1 }

</bundles_post_ra>
